<compile_context>
chip_gen: v7x
topology: tpu7x:2x2x1
jax: 0.10.0
libtpu: 0.0.40
codegen_flags: <defaults>
</compile_context>

<pallas_src>
import functools

import jax
import jax.numpy as jnp
from jax.experimental import pallas as pl
from jax.experimental.pallas import tpu as pltpu


def _dual_stream_kernel(vis_ref, ir_ref,
                        w1v_ref, b1v_ref, w2v_ref, b2v_ref,
                        w1i_ref, b1i_ref, w2i_ref, b2i_ref,
                        out_vis_ref, out_ir_ref):
    vis = vis_ref[...].astype(jnp.float32)   # (C, T)
    ir = ir_ref[...].astype(jnp.float32)     # (C, T)

    w1v = w1v_ref[...].astype(jnp.float32)   # (hid, C)
    b1v = b1v_ref[...].astype(jnp.float32)   # (hid, 1)
    w2v = w2v_ref[...].astype(jnp.float32)   # (C, hid)
    b2v = b2v_ref[...].astype(jnp.float32)   # (C, 1)
    w1i = w1i_ref[...].astype(jnp.float32)
    b1i = b1i_ref[...].astype(jnp.float32)
    w2i = w2i_ref[...].astype(jnp.float32)
    b2i = b2i_ref[...].astype(jnp.float32)

    # Visible attention gate is computed from the INFRARED features.
    h_v = jnp.dot(w1v, ir, preferred_element_type=jnp.float32) + b1v
    h_v = jnp.maximum(h_v, 0.0)
    att_v = jax.nn.sigmoid(
        jnp.dot(w2v, h_v, preferred_element_type=jnp.float32) + b2v)

    # Infrared attention gate is computed from the VISIBLE features.
    h_i = jnp.dot(w1i, vis, preferred_element_type=jnp.float32) + b1i
    h_i = jnp.maximum(h_i, 0.0)
    att_i = jax.nn.sigmoid(
        jnp.dot(w2i, h_i, preferred_element_type=jnp.float32) + b2i)

    out_vis_ref[...] = (vis * att_v).astype(out_vis_ref.dtype)
    out_ir_ref[...] = (ir * att_i).astype(out_ir_ref.dtype)


def _pick_spatial_tile(hw, c, itemsize, block_budget_bytes):
    """Largest lane-aligned spatial tile whose in/out blocks fit the budget.

    Block footprint per spatial column: 4 feature arrays (2 in + 2 out),
    double-buffered, C channels each, at `itemsize` bytes (>=4 to stay
    conservative w.r.t. in-kernel f32 temporaries).
    """
    per_col = 4 * 2 * c * max(int(itemsize), 4)
    max_t = max(128, (block_budget_bytes // per_col) // 128 * 128)
    if hw <= max_t:
        return hw           # one full-extent (possibly non-128-multiple) block
    return max_t            # multiple of 128; ragged last block is masked


@functools.partial(jax.jit, static_argnames=("t_hw", "block_budget_bytes"))
def dual_stream_alternating_enhancement(visible, infrared, params, *,
                                        t_hw=None,
                                        block_budget_bytes=12 * 1024 * 1024):
    """visible/infrared: (N, C, H, W). params: dict (Conv2d-style weights)."""
    assert visible.shape == infrared.shape, "inputs must have identical shapes"
    N, C, H, W = visible.shape
    HW = H * W
    hid = params["w1v"].shape[0]

    # Free (contiguous) collapse of the spatial dims — no HBM transpose/copy.
    vis3 = visible.reshape(N, C, HW)
    ir3 = infrared.reshape(N, C, HW)

    if t_hw is None:
        t_hw = _pick_spatial_tile(HW, C, jnp.dtype(visible.dtype).itemsize,
                                  block_budget_bytes)
    t_hw = min(t_hw, HW)

    grid = (N, pl.cdiv(HW, t_hw))

    feat_spec = pl.BlockSpec((pl.Squeezed(), C, t_hw), lambda n, j: (n, 0, j))

    def full(shape):
        # Constant index map -> weights/biases stay resident in VMEM.
        return pl.BlockSpec(shape, lambda n, j: (0, 0))

    out_vis3, out_ir3 = pl.pallas_call(
        _dual_stream_kernel,
        out_shape=(jax.ShapeDtypeStruct((N, C, HW), visible.dtype),
                   jax.ShapeDtypeStruct((N, C, HW), infrared.dtype)),
        grid_spec=pltpu.PrefetchScalarGridSpec(
            num_scalar_prefetch=0,
            grid=grid,
            in_specs=[feat_spec, feat_spec,
                      full((hid, C)), full((hid, 1)),
                      full((C, hid)), full((C, 1)),
                      full((hid, C)), full((hid, 1)),
                      full((C, hid)), full((C, 1))],
            out_specs=(feat_spec, feat_spec),
        ),
        compiler_params=pltpu.CompilerParams(
            dimension_semantics=("parallel", "parallel"),
            vmem_limit_bytes=32 * 1024 * 1024),
    )(vis3, ir3,
      params["w1v"], params["b1v"], params["w2v"], params["b2v"],
      params["w1i"], params["b1i"], params["w2i"], params["b2i"])

    return out_vis3.reshape(N, C, H, W), out_ir3.reshape(N, C, H, W)


def init_params(key, in_channels, reduction_ratio=4):
    hid = in_channels // reduction_ratio
    ks = jax.random.split(key, 8)
    s1 = 1.0 / jnp.sqrt(in_channels)
    s2 = 1.0 / jnp.sqrt(hid)
    # Conv2d-style (out_channels, in_channels) weights; biases as (out, 1)
    # so they broadcast along the lane (spatial) axis inside the kernel.
    return dict(
        w1v=jax.random.normal(ks[0], (hid, in_channels), jnp.float32) * s1,
        b1v=jax.random.normal(ks[1], (hid, 1), jnp.float32) * s1,
        w2v=jax.random.normal(ks[2], (in_channels, hid), jnp.float32) * s2,
        b2v=jax.random.normal(ks[3], (in_channels, 1), jnp.float32) * s2,
        w1i=jax.random.normal(ks[4], (hid, in_channels), jnp.float32) * s1,
        b1i=jax.random.normal(ks[5], (hid, 1), jnp.float32) * s1,
        w2i=jax.random.normal(ks[6], (in_channels, hid), jnp.float32) * s2,
        b2i=jax.random.normal(ks[7], (in_channels, 1), jnp.float32) * s2,
    )


def _reference(visible, infrared, p):
    """Pure-JAX reference of the PyTorch forward semantics (NCHW 1x1 convs)."""
    def branch(x, w1, b1, w2, b2):
        h = jnp.einsum("oc,nchw->nohw", w1, x) + b1.reshape(1, -1, 1, 1)
        h = jnp.maximum(h, 0.0)
        return jax.nn.sigmoid(
            jnp.einsum("oc,nchw->nohw", w2, h) + b2.reshape(1, -1, 1, 1))

    att_v = branch(infrared, p["w1v"], p["b1v"], p["w2v"], p["b2v"])
    att_i = branch(visible, p["w1i"], p["b1i"], p["w2i"], p["b2i"])
    return visible * att_v, infrared * att_i


if __name__ == "__main__":
    key = jax.random.PRNGKey(0)
    k1, k2, k3, k4, k5 = jax.random.split(key, 5)

    # --- main test: small NCHW shapes consistent with the module -----------
    N, C, H, W = 2, 16, 16, 16
    visible = jax.random.normal(k1, (N, C, H, W), jnp.float32)
    infrared = jax.random.normal(k2, (N, C, H, W), jnp.float32)
    params = init_params(k3, in_channels=C, reduction_ratio=4)

    out_vis, out_ir = dual_stream_alternating_enhancement(visible, infrared, params)
    jax.block_until_ready((out_vis, out_ir))

    ref_vis, ref_ir = _reference(visible, infrared, params)
    assert out_vis.shape == (N, C, H, W) and out_ir.shape == (N, C, H, W)
    assert jnp.allclose(out_vis, ref_vis, atol=1e-5, rtol=1e-5)
    assert jnp.allclose(out_ir, ref_ir, atol=1e-5, rtol=1e-5)

    # --- ragged-block test: force a small spatial tile (no jnp.pad used) ----
    H2, W2 = 20, 20  # HW = 400 = 3*128 + 16 -> ragged last block
    vis2 = jax.random.normal(k4, (N, C, H2, W2), jnp.float32)
    ir2 = jax.random.normal(k5, (N, C, H2, W2), jnp.float32)
    o_v2, o_i2 = dual_stream_alternating_enhancement(vis2, ir2, params, t_hw=128)
    jax.block_until_ready((o_v2, o_i2))
    r_v2, r_i2 = _reference(vis2, ir2, params)
    assert jnp.allclose(o_v2, r_v2, atol=1e-5, rtol=1e-5)
    assert jnp.allclose(o_i2, r_i2, atol=1e-5, rtol=1e-5)

    print("KERNEL_OK")
</pallas_src>

<mosaic_0001>
module attributes {stable_mosaic.version = 11 : i64} {
  func.func @_dual_stream_kernel(%arg0: i32, %arg1: i32, %arg2: memref<1x16x256xf32, #tpu.memory_space<vmem>>, %arg3: memref<1x16x256xf32, #tpu.memory_space<vmem>>, %arg4: memref<4x16xf32, #tpu.memory_space<vmem>>, %arg5: memref<4x1xf32, #tpu.memory_space<vmem>>, %arg6: memref<16x4xf32, #tpu.memory_space<vmem>>, %arg7: memref<16x1xf32, #tpu.memory_space<vmem>>, %arg8: memref<4x16xf32, #tpu.memory_space<vmem>>, %arg9: memref<4x1xf32, #tpu.memory_space<vmem>>, %arg10: memref<16x4xf32, #tpu.memory_space<vmem>>, %arg11: memref<16x1xf32, #tpu.memory_space<vmem>>, %arg12: memref<1x16x256xf32, #tpu.memory_space<vmem>>, %arg13: memref<1x16x256xf32, #tpu.memory_space<vmem>>) attributes {dimension_semantics = [#tpu.dimension_semantics<parallel>, #tpu.dimension_semantics<parallel>], iteration_bounds = array<i64: 2, 1>, scalar_prefetch = 0 : i64, scratch_operands = 0 : i64, tpu.core_type = #tpu.core_type<tc>, window_params = [{transform_indices = @transform_0, window_bounds = array<i64: 1, 16, 256>}, {transform_indices = @transform_1, window_bounds = array<i64: 1, 16, 256>}, {pipeline_mode = #tpu.pipeline_mode<synchronous>, transform_indices = @transform_2, window_bounds = array<i64: 4, 16>}, {pipeline_mode = #tpu.pipeline_mode<synchronous>, transform_indices = @transform_3, window_bounds = array<i64: 4, 1>}, {pipeline_mode = #tpu.pipeline_mode<synchronous>, transform_indices = @transform_4, window_bounds = array<i64: 16, 4>}, {pipeline_mode = #tpu.pipeline_mode<synchronous>, transform_indices = @transform_5, window_bounds = array<i64: 16, 1>}, {pipeline_mode = #tpu.pipeline_mode<synchronous>, transform_indices = @transform_6, window_bounds = array<i64: 4, 16>}, {pipeline_mode = #tpu.pipeline_mode<synchronous>, transform_indices = @transform_7, window_bounds = array<i64: 4, 1>}, {pipeline_mode = #tpu.pipeline_mode<synchronous>, transform_indices = @transform_8, window_bounds = array<i64: 16, 4>}, {pipeline_mode = #tpu.pipeline_mode<synchronous>, transform_indices = @transform_9, window_bounds = array<i64: 16, 1>}, {transform_indices = @transform_10, window_bounds = array<i64: 1, 16, 256>}, {transform_indices = @transform_11, window_bounds = array<i64: 1, 16, 256>}]} {
    %c0 = arith.constant 0 : index
    %c0_0 = arith.constant 0 : index
    %c0_1 = arith.constant 0 : index
    %0 = vector.load %arg2[%c0, %c0_0, %c0_1] : memref<1x16x256xf32, #tpu.memory_space<vmem>>, vector<1x16x256xf32>
    %1 = vector.shape_cast %0 : vector<1x16x256xf32> to vector<16x256xf32>
    %c0_2 = arith.constant 0 : index
    %c0_3 = arith.constant 0 : index
    %c0_4 = arith.constant 0 : index
    %2 = vector.load %arg3[%c0_2, %c0_3, %c0_4] : memref<1x16x256xf32, #tpu.memory_space<vmem>>, vector<1x16x256xf32>
    %3 = vector.shape_cast %2 : vector<1x16x256xf32> to vector<16x256xf32>
    %c0_5 = arith.constant 0 : index
    %c0_6 = arith.constant 0 : index
    %4 = vector.load %arg4[%c0_5, %c0_6] : memref<4x16xf32, #tpu.memory_space<vmem>>, vector<4x16xf32>
    %c0_7 = arith.constant 0 : index
    %c0_8 = arith.constant 0 : index
    %5 = vector.load %arg5[%c0_7, %c0_8] : memref<4x1xf32, #tpu.memory_space<vmem>>, vector<4x1xf32>
    %c0_9 = arith.constant 0 : index
    %c0_10 = arith.constant 0 : index
    %6 = vector.load %arg6[%c0_9, %c0_10] : memref<16x4xf32, #tpu.memory_space<vmem>>, vector<16x4xf32>
    %c0_11 = arith.constant 0 : index
    %c0_12 = arith.constant 0 : index
    %7 = vector.load %arg7[%c0_11, %c0_12] : memref<16x1xf32, #tpu.memory_space<vmem>>, vector<16x1xf32>
    %c0_13 = arith.constant 0 : index
    %c0_14 = arith.constant 0 : index
    %8 = vector.load %arg8[%c0_13, %c0_14] : memref<4x16xf32, #tpu.memory_space<vmem>>, vector<4x16xf32>
    %c0_15 = arith.constant 0 : index
    %c0_16 = arith.constant 0 : index
    %9 = vector.load %arg9[%c0_15, %c0_16] : memref<4x1xf32, #tpu.memory_space<vmem>>, vector<4x1xf32>
    %c0_17 = arith.constant 0 : index
    %c0_18 = arith.constant 0 : index
    %10 = vector.load %arg10[%c0_17, %c0_18] : memref<16x4xf32, #tpu.memory_space<vmem>>, vector<16x4xf32>
    %c0_19 = arith.constant 0 : index
    %c0_20 = arith.constant 0 : index
    %11 = vector.load %arg11[%c0_19, %c0_20] : memref<16x1xf32, #tpu.memory_space<vmem>>, vector<16x1xf32>
    %cst = arith.constant dense<0.000000e+00> : vector<4x256xf32>
    %12 = tpu.matmul %4, %3, %cst {dimension_numbers = #tpu.dot_dimension_numbers<[1], [0], [0], [1], [0, 0, 1, 1], [], []>} : vector<4x16xf32>, vector<16x256xf32>, vector<4x256xf32> -> vector<4x256xf32>
    %13 = vector.broadcast %5 : vector<4x1xf32> to vector<4x256xf32>
    %14 = arith.addf %12, %13 : vector<4x256xf32>
    %cst_21 = arith.constant 0.000000e+00 : f32
    %15 = vector.broadcast %cst_21 : f32 to vector<4x256xf32>
    %16 = arith.maximumf %14, %15 : vector<4x256xf32>
    %cst_22 = arith.constant dense<0.000000e+00> : vector<16x256xf32>
    %17 = tpu.matmul %6, %16, %cst_22 {dimension_numbers = #tpu.dot_dimension_numbers<[1], [0], [0], [1], [0, 0, 1, 1], [], []>} : vector<16x4xf32>, vector<4x256xf32>, vector<16x256xf32> -> vector<16x256xf32>
    %18 = vector.broadcast %7 : vector<16x1xf32> to vector<16x256xf32>
    %19 = arith.addf %17, %18 : vector<16x256xf32>
    %20 = arith.negf %19 : vector<16x256xf32>
    %21 = math.exp %20 : vector<16x256xf32>
    %cst_23 = arith.constant 1.000000e+00 : f32
    %22 = vector.broadcast %cst_23 : f32 to vector<16x256xf32>
    %23 = arith.addf %22, %21 : vector<16x256xf32>
    %24 = arith.divf %22, %23 : vector<16x256xf32>
    %cst_24 = arith.constant dense<0.000000e+00> : vector<4x256xf32>
    %25 = tpu.matmul %8, %1, %cst_24 {dimension_numbers = #tpu.dot_dimension_numbers<[1], [0], [0], [1], [0, 0, 1, 1], [], []>} : vector<4x16xf32>, vector<16x256xf32>, vector<4x256xf32> -> vector<4x256xf32>
    %26 = vector.broadcast %9 : vector<4x1xf32> to vector<4x256xf32>
    %27 = arith.addf %25, %26 : vector<4x256xf32>
    %cst_25 = arith.constant 0.000000e+00 : f32
    %28 = vector.broadcast %cst_25 : f32 to vector<4x256xf32>
    %29 = arith.maximumf %27, %28 : vector<4x256xf32>
    %cst_26 = arith.constant dense<0.000000e+00> : vector<16x256xf32>
    %30 = tpu.matmul %10, %29, %cst_26 {dimension_numbers = #tpu.dot_dimension_numbers<[1], [0], [0], [1], [0, 0, 1, 1], [], []>} : vector<16x4xf32>, vector<4x256xf32>, vector<16x256xf32> -> vector<16x256xf32>
    %31 = vector.broadcast %11 : vector<16x1xf32> to vector<16x256xf32>
    %32 = arith.addf %30, %31 : vector<16x256xf32>
    %33 = arith.negf %32 : vector<16x256xf32>
    %34 = math.exp %33 : vector<16x256xf32>
    %cst_27 = arith.constant 1.000000e+00 : f32
    %35 = vector.broadcast %cst_27 : f32 to vector<16x256xf32>
    %36 = arith.addf %35, %34 : vector<16x256xf32>
    %37 = arith.divf %35, %36 : vector<16x256xf32>
    %38 = arith.mulf %1, %24 : vector<16x256xf32>
    %c0_28 = arith.constant 0 : index
    %c0_29 = arith.constant 0 : index
    %c0_30 = arith.constant 0 : index
    %39 = vector.load %arg12[%c0_28, %c0_29, %c0_30] : memref<1x16x256xf32, #tpu.memory_space<vmem>>, vector<1x16x256xf32>
    %40 = vector.shape_cast %39 : vector<1x16x256xf32> to vector<16x256xf32>
    %41 = vector.shape_cast %38 : vector<16x256xf32> to vector<1x16x256xf32>
    tpu.vector_store %arg12[%c0_28, %c0_29, %c0_30], %41 {strides = array<i32>} : memref<1x16x256xf32, #tpu.memory_space<vmem>>, vector<1x16x256xf32>,
    %42 = arith.mulf %3, %37 : vector<16x256xf32>
    %c0_31 = arith.constant 0 : index
    %c0_32 = arith.constant 0 : index
    %c0_33 = arith.constant 0 : index
    %43 = vector.load %arg13[%c0_31, %c0_32, %c0_33] : memref<1x16x256xf32, #tpu.memory_space<vmem>>, vector<1x16x256xf32>
    %44 = vector.shape_cast %43 : vector<1x16x256xf32> to vector<16x256xf32>
    %45 = vector.shape_cast %42 : vector<16x256xf32> to vector<1x16x256xf32>
    tpu.vector_store %arg13[%c0_31, %c0_32, %c0_33], %45 {strides = array<i32>} : memref<1x16x256xf32, #tpu.memory_space<vmem>>, vector<1x16x256xf32>,
    return
  }
  func.func @transform_0(%arg0: i32, %arg1: i32) -> (i32, i32, i32) {
    %c0_i32 = arith.constant 0 : i32
    %c0_i32_0 = arith.constant 0 : i32
    return %arg0, %c0_i32, %arg1 : i32, i32, i32
  }
  func.func @transform_1(%arg0: i32, %arg1: i32) -> (i32, i32, i32) {
    %c0_i32 = arith.constant 0 : i32
    %c0_i32_0 = arith.constant 0 : i32
    return %arg0, %c0_i32, %arg1 : i32, i32, i32
  }
  func.func @transform_2(%arg0: i32, %arg1: i32) -> (i32, i32) {
    %c0_i32 = arith.constant 0 : i32
    %c0_i32_0 = arith.constant 0 : i32
    %c0_i32_1 = arith.constant 0 : i32
    return %c0_i32, %c0_i32_0 : i32, i32
  }
  func.func @transform_3(%arg0: i32, %arg1: i32) -> (i32, i32) {
    %c0_i32 = arith.constant 0 : i32
    %c0_i32_0 = arith.constant 0 : i32
    %c0_i32_1 = arith.constant 0 : i32
    return %c0_i32, %c0_i32_0 : i32, i32
  }
  func.func @transform_4(%arg0: i32, %arg1: i32) -> (i32, i32) {
    %c0_i32 = arith.constant 0 : i32
    %c0_i32_0 = arith.constant 0 : i32
    %c0_i32_1 = arith.constant 0 : i32
    return %c0_i32, %c0_i32_0 : i32, i32
  }
  func.func @transform_5(%arg0: i32, %arg1: i32) -> (i32, i32) {
    %c0_i32 = arith.constant 0 : i32
    %c0_i32_0 = arith.constant 0 : i32
    %c0_i32_1 = arith.constant 0 : i32
    return %c0_i32, %c0_i32_0 : i32, i32
  }
  func.func @transform_6(%arg0: i32, %arg1: i32) -> (i32, i32) {
    %c0_i32 = arith.constant 0 : i32
    %c0_i32_0 = arith.constant 0 : i32
    %c0_i32_1 = arith.constant 0 : i32
    return %c0_i32, %c0_i32_0 : i32, i32
  }
  func.func @transform_7(%arg0: i32, %arg1: i32) -> (i32, i32) {
    %c0_i32 = arith.constant 0 : i32
    %c0_i32_0 = arith.constant 0 : i32
    %c0_i32_1 = arith.constant 0 : i32
    return %c0_i32, %c0_i32_0 : i32, i32
  }
  func.func @transform_8(%arg0: i32, %arg1: i32) -> (i32, i32) {
    %c0_i32 = arith.constant 0 : i32
    %c0_i32_0 = arith.constant 0 : i32
    %c0_i32_1 = arith.constant 0 : i32
    return %c0_i32, %c0_i32_0 : i32, i32
  }
  func.func @transform_9(%arg0: i32, %arg1: i32) -> (i32, i32) {
    %c0_i32 = arith.constant 0 : i32
    %c0_i32_0 = arith.constant 0 : i32
    %c0_i32_1 = arith.constant 0 : i32
    return %c0_i32, %c0_i32_0 : i32, i32
  }
  func.func @transform_10(%arg0: i32, %arg1: i32) -> (i32, i32, i32) {
    %c0_i32 = arith.constant 0 : i32
    %c0_i32_0 = arith.constant 0 : i32
    return %arg0, %c0_i32, %arg1 : i32, i32, i32
  }
  func.func @transform_11(%arg0: i32, %arg1: i32) -> (i32, i32, i32) {
    %c0_i32 = arith.constant 0 : i32
    %c0_i32_0 = arith.constant 0 : i32
    return %arg0, %c0_i32, %arg1 : i32, i32, i32
  }
}

</mosaic_0001>

<bundles_post_ra>
// kernel: dual_stream_alternating_enhancement.1
= control target key start
LH: loop header
LB: loop body
LE: loop exit
PB: predicated region body
PF: predicated region fallthrough
CT: control target
= control target key end

     0   :  { %s1281_s17 = smov 0   ;;  %s1283_s18 = smov 0   ;;  %s1404_s0 = inlined_call_operand.vmem [shape: f32[2,16,256], index: 0, kind: input, shape index: {}]   ;;  %s1405_s1 = inlined_call_operand.vmem [shape: f32[2,16,256], index: 1, kind: input, shape index: {}]   ;;  %s1406_s2 = inlined_call_operand.vmem [shape: f32[4,16], index: 2, kind: input, shape index: {}]   ;;  %s1407_s3 = inlined_call_operand.vmem [shape: f32[4,1], index: 3, kind: input, shape index: {}]   ;;  %s1408_s4 = inlined_call_operand.vmem [shape: f32[16,4], index: 4, kind: input, shape index: {}]   ;;  %s1409_s5 = inlined_call_operand.vmem [shape: f32[16,1], index: 5, kind: input, shape index: {}]   ;;  %s1410_s6 = inlined_call_operand.vmem [shape: f32[4,16], index: 6, kind: input, shape index: {}]   ;;  %s1411_s7 = inlined_call_operand.vmem [shape: f32[4,1], index: 7, kind: input, shape index: {}]   ;;  %s1412_s8 = inlined_call_operand.vmem [shape: f32[16,4], index: 8, kind: input, shape index: {}]   ;;  %s1413_s9 = inlined_call_operand.vmem [shape: f32[16,1], index: 9, kind: input, shape index: {}]   ;;  %s1414_s10 = inlined_call_operand.vmem [shape: f32[2,16,256], index: 10, kind: output, shape index: {0}]   ;;  %s1415_s11 = inlined_call_operand.vmem [shape: f32[2,16,256], index: 11, kind: output, shape index: {1}]  }
   0x1   :  { %s1285_s19 = smov 0  }
   0x2 LB: > { %s34_s20 = sadd.s32 1, %s1213_s18  ;;  %p1092_p0 = scmp.ge.s32.totalorder %s1217_s19, 1  ;;  %s1217_s19 = sphi %s1285_s19, %s22_s19   ;;  %s1213_s18 = sphi %s1283_s18, %s1417_s18   ;;  %s1209_s17 = sphi %s1281_s17, %s1416_s17  }
   0x3   : > { %p36_p1 = scmp.ge.s32.totalorder %s34_s20, 2  ;;  %p380_p2 = scmp.lt.s32.totalorder %s1217_s19, 3 }
   0x5   : > { %s1419_s20 = smov (%p36_p1, %s34_s20), 0  ;;  %p381_p3 = pnand %p1092_p0, %p380_p2 }
   0x6   : > { %p447_p4 = scmp.lt.s32.totalorder (!%p381_p3), %s1209_s17, 1  ;;  %v1219_v0 = vmov (!%p381_p3), 0.0   ;;  %v1220_v1 = vmov (!%p381_p3), 0   ;;  %v495_v2 = vld [vmem:[%s1407_s3] sm:$0xf] (!%p381_p3)  ;;  %vm511_vm0 = vcmask (!%p381_p3), 130048  }
   0x7   : > { %384 = sbr.rel (%p381_p3) target bundleno = 714 (0x2ca), region = 60  ;;  %579 = vmatprep.mubr.f32.mxu0 (!%p381_p3), %v1219_v0  ;;  %1161 = vset.pattern.permute.xlu0 (!%p381_p3), %v1220_v1  ;;  %v501_v3 = vld [vmem:[%s1411_s7] sm:$0xf] (!%p381_p3)  ;;  %vm605_vm1 = vcmask (!%p381_p3), 1043456   ;;  %vm598_vm2 = vcmask (!%p381_p3), 31744   ;;  %v497_v28 = vld [vmem:[%s1408_s4 + $0x8] sm:$0xff] (!%p381_p3) }
   0x8   : > { %508 = vperm.xlu0 (!%p381_p3), %1161, %v495_v2   ;;  %1162 = vset.pattern.permute.xlu1 (!%p381_p3), %v1220_v1  ;;  %v504_v9 = vld [vmem:[%s1413_s9] sm:$0xff] (!%p381_p3)  ;;  %v499_v29 = vld [vmem:[%s1409_s5 + $0x8] sm:$0xff] (!%p381_p3) }
   0x9   : > { %682 = vmatprep.mubr.f32.mxu1 (!%p381_p3), %v1219_v0  ;;  %v494_v11 = vld [vmem:[%s1406_s2] sm:$0xf] (!%p381_p3)  ;;  %v505_v30 = vld [vmem:[%s1413_s9 + $0x8] sm:$0xff] (!%p381_p3) }
   0xa   : > { %v498_v12 = vld [vmem:[%s1409_s5] sm:$0xff] (!%p381_p3)  ;;  %v503_v46 = vld [vmem:[%s1412_s8 + $0x8] sm:$0xff] (!%p381_p3) }
   0xb   : > { %590 = vperm.xlu1 (!%p381_p3), %1162, %v498_v12   ;;  %v496_v25 = vld [vmem:[%s1408_s4] sm:$0xff] (!%p381_p3) }
   0xc   : > { %715 = vperm.xlu0 (!%p381_p3), %1161, %v501_v3   ;;  %v500_v27 = vld [vmem:[%s1410_s6] sm:$0xf] (!%p381_p3) }
   0xd   : > { %v502_v45 = vld [vmem:[%s1412_s8] sm:$0xff] (!%p381_p3) }
   0xe   : > { %s1421_s17 = smov (!%p447_p4, %s1209_s17), 1 }
   0xf   : > { %s1307_s25 = sshll.u32 %s1421_s17, 5  ;;  %595 = vperm.xlu1 %1162, %v499_v29  }
  0x10   : > { %s464_s28 = scalar_lea.vmem %s1405_s1, %s1307_s25  ;;  %796 = vperm.xlu0 %1161, %v504_v9   ;;  %s454_s21 = scalar_lea.vmem %s1404_s0, %s1307_s25 }
  0x11   : > { %v1313_v4 = vld [vmem:[%s464_s28 + $0x8] sm:$0xff]  ;;  %v1315_v5 = vld [vmem:[%s464_s28 + $0x18] sm:$0xff]  ;;  %v1317_v6 = vld [vmem:[%s464_s28] sm:$0xff]  ;;  %s474_s23 = scalar_lea.vmem %s1414_s10, %s1307_s25  ;;  %s484_s27 = scalar_lea.vmem %s1415_s11, %s1307_s25 }
  0x12   : > { %v1125_v7 = vpack.c.bf16 %v1315_v5, %v1313_v4  ;;  %v1321_v8 = vld [vmem:[%s464_s28 + $0x10] sm:$0xff]  ;;  %v487_v17 = vld [vmem:[%s454_s21 + $0x8] sm:$0xff]  ;;  %v1340_v18 = vld [vmem:[%s454_s21 + $0x18] sm:$0xff] }
  0x13   : > { %v1127_v10 = vpack.c.bf16 %v1321_v8, %v1317_v6  ;;  %v486_v20 = vld [vmem:[%s454_s21] sm:$0xff]  ;;  %v1342_v21 = vld [vmem:[%s454_s21 + $0x10] sm:$0xff]  ;;  %v1129_v23 = vpack.c.bf16 %v1340_v18, %v487_v17  ;;  %801 = vperm.xlu1 %1162, %v505_v30  }
  0x14   : > { %1126 = vmatprep.subr.bf16.mxu0 %v1125_v7  ;;  %v1131_v26 = vpack.c.bf16 %v1342_v21, %v486_v20 }
  0x15   : > { %1128 = vmatpush1.bf16.msra.mxu0 %v1127_v10 }
  0x18   : > { %1101 = vmatmul.mubr.msk.f32.vlgmr.msra.gmra.mrb[0].mxu0 %vm511_vm0, %v494_v11 }
  0x19   : > { %676 = vmatprep.mubr.f32.mxu0 %v1219_v0 }
  0x87   : > { %v509_v13 = vpop.permute.xlu0 %508 }
  0x8a   : > { %v591_v31 = vpop.permute.xlu1 %590 }
  0x8b   : > { %v716_v37 = vpop.permute.xlu0 %715 }
  0x8e   : > { %v596_v55 = vpop.permute.xlu1 %595 }
  0x8f   : > { %v797_v10 = vpop.permute.xlu0 %796 }
  0xeb   : > { %v581_v14 = vpop.f32.mrb[0].mxu0 }
  0xec   : > { %v582_v15 = vadd.f32 %v581_v14, %v509_v13  ;;  %v583_v16 = vpop.f32.mrb[1].mxu0 }
  0xed   : > { %v584_v19 = vadd.f32 %v583_v16, %v509_v13  ;;  %v802_v16 = vpop.permute.xlu1 %801 }
  0xee   : > { %v586_v24 = vmax.f32 %v582_v15, 0.0 }
  0xef   : > { %v587_v22 = vmax.f32 %v584_v19, 0.0 }
  0xf1   : > { %1102 = vmatprep.subr.msk.mxu0 %vm605_vm1, %v587_v22  ;;  %1133 = vmatprep.subr.msk.mxu1 %vm605_vm1, %v587_v22 }
  0xf2   : > { %1103 = vmatpush1.msk.msra.mxu0 %vm605_vm1, %v586_v24  ;;  %1134 = vmatpush1.msk.msra.mxu1 %vm605_vm1, %v586_v24 }
  0xf3   : > { %1104 = vmatmul.mubr.msk.f32.vlgmr.msra.gmra.mrb[2].mxu0 %vm598_vm2, %v496_v25  ;;  %1130 = vmatprep.subr.bf16.mxu0 %v1129_v23 }
  0xf4   : > { %1132 = vmatpush1.bf16.msra.mxu0 %v1131_v26  ;;  %785 = vmatprep.mubr.f32.mxu0 %v1219_v0 }
  0xf5   : > { %1105 = vmatmul.mubr.msk.f32.vlgmr.msra.gmra.mrb[0].mxu1 %vm598_vm2, %v497_v28 }
  0xf6   : > { %880 = vmatprep.mubr.f32.mxu1 %v1219_v0 }
  0xf7   : > { %1110 = vmatmul.mubr.msk.f32.vlgmr.msra.gmra.mrb[4].mxu0 %vm511_vm0, %v500_v27 }
 0x1c6   : > { %v678_v32 = vpop.f32.mrb[2].mxu0 }
 0x1c7   : > { %v679_v33 = vadd.f32 %v678_v32, %v591_v31  ;;  %v680_v34 = vpop.f32.mrb[3].mxu0 }
 0x1c8   : > { %v681_v35 = vadd.f32 %v680_v34, %v591_v31  ;;  %v684_v56 = vpop.f32.mrb[0].mxu1 }
 0x1c9   : > { %v1106_v36 = vmul.f32 -1.442695, %v679_v33  ;;  %v685_v57 = vadd.f32 %v684_v56, %v596_v55  ;;  %v686_v58 = vpop.f32.mrb[1].mxu1 }
 0x1ca   : > { %v1107_v38 = vmul.f32 -1.442695, %v681_v35  ;;  %v787_v39 = vpop.f32.mrb[4].mxu0  ;;  %v687_v59 = vadd.f32 %v686_v58, %v596_v55 }
 0x1cb   : > { %1163 = vpow2.f32 %v1106_v36  ;;  %v788_v40 = vadd.f32 %v787_v39, %v716_v37  ;;  %v789_v41 = vpop.f32.mrb[5].mxu0  ;;  %v1108_v60 = vmul.f32 -1.442695, %v685_v57 }
 0x1cc   : > { %1165 = vpow2.f32 %v1107_v38  ;;  %v790_v42 = vadd.f32 %v789_v41, %v716_v37  ;;  %v1109_v61 = vmul.f32 -1.442695, %v687_v59 }
 0x1cd   : > { %v792_v44 = vmax.f32 %v788_v40, 0.0 }
 0x1ce   : > { %v793_v43 = vmax.f32 %v790_v42, 0.0 }
 0x1d0   : > { %1111 = vmatprep.subr.msk.mxu1 %vm605_vm1, %v793_v43 }
 0x1d1   : > { %1112 = vmatpush1.msk.msra.mxu1 %vm605_vm1, %v792_v44 }
 0x1d2   : > { %1113 = vmatmul.mubr.msk.f32.vlgmr.msra.gmra.mrb[2].mxu1 %vm598_vm2, %v502_v45 }
 0x1d3   : > { %886 = vmatprep.mubr.f32.mxu1 %v1219_v0 }
 0x1d5   : > { %v1164_v47 = vpop.eup %1163 }
 0x1d6   : > { %v1166_v48 = vpop.eup %1165  ;;  %v701_v49 = vadd.f32 1.0, %v1164_v47  ;;  %1114 = vmatmul.mubr.msk.f32.gmra.mrb[4].mxu1 %vm598_vm2, %v503_v46 }
 0x1d7   : > { %v702_v50 = vadd.f32 1.0, %v1166_v48 }
 0x1d8   : > { %1167 = vrcp.f32 %v701_v49 }
 0x1d9   : > { %1169 = vrcp.f32 %v702_v50 }
 0x1da   : > { %1171 = vpow2.f32 %v1108_v60 }
 0x1db   : > { %1173 = vpow2.f32 %v1109_v61 }
 0x1e2   : > { %v1168_v51 = vpop.eup %1167 }
 0x1e3   : > { %v1170_v52 = vpop.eup %1169  ;;  %v917_v53 = vmul.f32 %v1168_v51, %v486_v20 }
 0x1e4   : > { %v918_v54 = vmul.f32 %v1170_v52, %v487_v17  ;;  %v1172_v62 = vpop.eup %1171 }
 0x1e5   : > { %921 = vst [vmem:[%s474_s23] sm:$0xff] %v917_v53  ;;  %v1174_v63 = vpop.eup %1173  ;;  %v703_v0 = vadd.f32 1.0, %v1172_v62 }
 0x1e6   : > { %922 = vst [vmem:[%s474_s23 + $0x8] sm:$0xff] %v918_v54  ;;  %v704_v1 = vadd.f32 1.0, %v1174_v63 }
 0x1e7   : > { %1175 = vrcp.f32 %v703_v0 }
 0x1e8   : > { %1177 = vrcp.f32 %v704_v1 }
 0x1f1   : > { %v1176_v2 = vpop.eup %1175 }
 0x1f2   : > { %v1178_v3 = vpop.eup %1177  ;;  %v919_v7 = vmul.f32 %v1176_v2, %v1342_v21 }
 0x1f3   : > { %v920_v9 = vmul.f32 %v1178_v3, %v1340_v18 }
 0x1f4   : > { %923 = vst [vmem:[%s474_s23 + $0x10] sm:$0xff] %v919_v7 }
 0x1f5   : > { %924 = vst [vmem:[%s474_s23 + $0x18] sm:$0xff] %v920_v9 }
 0x2a5   : > { %v882_v11 = vpop.f32.mrb[2].mxu1 }
 0x2a6   : > { %v883_v12 = vadd.f32 %v882_v11, %v797_v10  ;;  %v884_v13 = vpop.f32.mrb[3].mxu1 }
 0x2a7   : > { %v885_v14 = vadd.f32 %v884_v13, %v797_v10 }
 0x2a8   : > { %v1115_v15 = vmul.f32 -1.442695, %v883_v12 }
 0x2a9   : > { %v1116_v17 = vmul.f32 -1.442695, %v885_v14  ;;  %v888_v19 = vpop.f32.mrb[4].mxu1 }
 0x2aa   : > { %1179 = vpow2.f32 %v1115_v15  ;;  %v889_v20 = vadd.f32 %v888_v19, %v802_v16  ;;  %v890_v22 = vpop.f32.mrb[5].mxu1 }
 0x2ab   : > { %1181 = vpow2.f32 %v1116_v17  ;;  %v891_v23 = vadd.f32 %v890_v22, %v802_v16 }
 0x2ac   : > { %v1117_v24 = vmul.f32 -1.442695, %v889_v20 }
 0x2ad   : > { %v1118_v21 = vmul.f32 -1.442695, %v891_v23 }
 0x2ae   : > { %1183 = vpow2.f32 %v1117_v24 }
 0x2af   : > { %1185 = vpow2.f32 %v1118_v21 }
 0x2b4   : > { %v1180_v18 = vpop.eup %1179 }
 0x2b5   : > { %v1182_v25 = vpop.eup %1181  ;;  %v905_v26 = vadd.f32 1.0, %v1180_v18 }
 0x2b6   : > { %v906_v27 = vadd.f32 1.0, %v1182_v25 }
 0x2b7   : > { %1187 = vrcp.f32 %v905_v26 }
 0x2b8   : > { %v1184_v28 = vpop.eup %1183  ;;  %1189 = vrcp.f32 %v906_v27 }
 0x2b9   : > { %v1186_v29 = vpop.eup %1185  ;;  %v907_v30 = vadd.f32 1.0, %v1184_v28 }
 0x2ba   : > { %v908_v31 = vadd.f32 1.0, %v1186_v29 }
 0x2bb   : > { %1191 = vrcp.f32 %v907_v30 }
 0x2bc   : > { %1193 = vrcp.f32 %v908_v31 }
 0x2c1   : > { %v1188_v32 = vpop.eup %1187 }
 0x2c2   : > { %v1190_v33 = vpop.eup %1189  ;;  %v925_v34 = vmul.f32 %v1188_v32, %v1317_v6 }
 0x2c3   : > { %v926_v35 = vmul.f32 %v1190_v33, %v1313_v4 }
 0x2c4   : > { %929 = vst [vmem:[%s484_s27] sm:$0xff] %v925_v34 }
 0x2c5   : > { %v1192_v36 = vpop.eup %1191  ;;  %930 = vst [vmem:[%s484_s27 + $0x8] sm:$0xff] %v926_v35 }
 0x2c6   : > { %v1194_v37 = vpop.eup %1193  ;;  %v927_v38 = vmul.f32 %v1192_v36, %v1321_v8 }
 0x2c7   : > { %v928_v39 = vmul.f32 %v1194_v37, %v1315_v5 }
 0x2c8   : > { %931 = vst [vmem:[%s484_s27 + $0x10] sm:$0xff] %v927_v38 }
 0x2c9   : > { %932 = vst [vmem:[%s484_s27 + $0x18] sm:$0xff] %v928_v39 }
 0x2ca PF: > { %s22_s19 = sadd.s32 1, %s1217_s19   ;;  %s1416_s17 = smov %s1213_s18 }
 0x2cb   : > { %p19_p5 = scmp.ge.s32.totalorder %s22_s19, 4   ;;  %s1417_s18 = smov %s1419_s20 }
 0x2cd   :  { %21 = sbr.rel (!%p19_p5) target bundleno = 2 (0x2), region = 105 }

</bundles_post_ra>
